<compile_context>
chip_gen: v6e
topology: v6e:2x2x1
jax: 0.10.0
libtpu: 0.0.40
codegen_flags: <defaults>
</compile_context>

<pallas_src>
import functools

import jax
import jax.numpy as jnp
from jax.experimental import pallas as pl
from jax.experimental.pallas import tpu as pltpu


def _pick_hw_tile(hw, max_tile=2048):
    """Largest multiple of 128 that divides hw, capped at max_tile.

    Falls back to the full extent (allowed by BlockSpec) if hw is not a
    multiple of 128."""
    if hw % 128 != 0:
        return hw
    best = 128
    t = 128
    while t <= min(hw, max_tile):
        if hw % t == 0:
            best = t
        t += 128
    return best


def _pick_c_tile(c):
    """Split channels into 2 tiles (each a multiple of 8) when possible so the
    leading 'parallel' grid axis can be sharded across v7x's two TensorCores."""
    if c >= 16 and c % 16 == 0:
        return c // 2
    return c


def _stats_scale_bias_kernel(x_ref, gamma_ref, beta_ref, rmean_ref, rstd_ref,
                             scale_ref, bias_ref,
                             sum_acc, sumsq_acc,
                             *, eps, r_max, d_max, n_reduce):
    """Pass 1: per-channel sum / sum-of-squares -> folded (scale, bias)."""
    n_idx = pl.program_id(1)
    hw_idx = pl.program_id(2)

    @pl.when(jnp.logical_and(n_idx == 0, hw_idx == 0))
    def _init():
        sum_acc[...] = jnp.zeros_like(sum_acc)
        sumsq_acc[...] = jnp.zeros_like(sumsq_acc)

    x = x_ref[0].astype(jnp.float32)          # (C_tile, TILE_HW)
    sum_acc[...] += x
    sumsq_acc[...] += x * x

    @pl.when(jnp.logical_and(n_idx == pl.num_programs(1) - 1,
                             hw_idx == pl.num_programs(2) - 1))
    def _finalize():
        s = jnp.sum(sum_acc[...], axis=1, keepdims=True)       # (C_tile, 1)
        ss = jnp.sum(sumsq_acc[...], axis=1, keepdims=True)    # (C_tile, 1)

        mean = s / n_reduce
        # Unbiased variance (torch.std default). E[x^2]-E[x]^2 form; clamp at 0
        # to absorb tiny fp cancellation. Guard n_reduce==1 edge case.
        denom = max(n_reduce - 1.0, 1.0)
        var = jnp.maximum(ss - n_reduce * mean * mean, 0.0) / denom
        std = jnp.clip(jnp.sqrt(var), eps, 1.0e10)

        gamma = gamma_ref[...]
        beta = beta_ref[...]
        rmean = rmean_ref[...]
        rstd = rstd_ref[...]

        # Matches PyTorch exactly, including division by running_avg_std with
        # no epsilon (inf is produced and then clamped, as in the module).
        r = jnp.clip(std / rstd, 1.0 / r_max, r_max)
        d = jnp.clip((mean - rmean) / rstd, -d_max, d_max)

        # Fold everything per-channel:
        #   y = gamma * ((x - mean) * r / std + d) + beta
        #     = x * scale + bias
        scale = gamma * r / std
        bias = gamma * d + beta - mean * scale

        scale_ref[...] = scale
        bias_ref[...] = bias


def _normalize_kernel(x_ref, scale_ref, bias_ref, o_ref):
    """Pass 2: y = x * scale + bias (one mul + one add per element)."""
    x = x_ref[0].astype(jnp.float32)                   # (C_tile, TILE_HW)
    y = x * scale_ref[...] + bias_ref[...]
    o_ref[0, :, :] = y.astype(o_ref.dtype)


def batch_renorm_2d(x, gamma, beta, running_avg_mean, running_avg_std,
                    *, eps=1e-5, r_max=1.0, d_max=0.0):
    """Training-mode forward of BatchRenormalization2D.

    x: (N, C, H, W) float32
    gamma, beta, running_avg_mean, running_avg_std: (1, C, 1, 1) float32
    Returns y with the same shape as x.
    """
    N, C, H, W = x.shape
    hw = H * W
    nhw = N * hw

    # Free, contiguous reshape -- no transposes on either side.
    x3 = x.reshape(N, C, hw)
    g2 = gamma.reshape(C, 1).astype(jnp.float32)
    b2 = beta.reshape(C, 1).astype(jnp.float32)
    m2 = running_avg_mean.reshape(C, 1).astype(jnp.float32)
    s2 = running_avg_std.reshape(C, 1).astype(jnp.float32)

    tile_hw = _pick_hw_tile(hw)
    tile_c = _pick_c_tile(C)
    num_hw = hw // tile_hw
    num_c = C // tile_c

    vmem_limit = 32 * 1024 * 1024  # safe on v5e/v6e/v7x; tiles stay well under.

    # ---------------- Pass 1: per-channel stats -> (scale, bias) -------------
    stats_kernel = functools.partial(
        _stats_scale_bias_kernel,
        eps=float(eps), r_max=float(r_max), d_max=float(d_max),
        n_reduce=float(nhw))

    scale, bias = pl.pallas_call(
        stats_kernel,
        out_shape=(jax.ShapeDtypeStruct((C, 1), jnp.float32),
                   jax.ShapeDtypeStruct((C, 1), jnp.float32)),
        grid=(num_c, N, num_hw),
        in_specs=[
            pl.BlockSpec((1, tile_c, tile_hw), lambda c, n, h: (n, c, h)),
            pl.BlockSpec((tile_c, 1), lambda c, n, h: (c, 0)),
            pl.BlockSpec((tile_c, 1), lambda c, n, h: (c, 0)),
            pl.BlockSpec((tile_c, 1), lambda c, n, h: (c, 0)),
            pl.BlockSpec((tile_c, 1), lambda c, n, h: (c, 0)),
        ],
        out_specs=(
            pl.BlockSpec((tile_c, 1), lambda c, n, h: (c, 0)),
            pl.BlockSpec((tile_c, 1), lambda c, n, h: (c, 0)),
        ),
        scratch_shapes=[pltpu.VMEM((tile_c, tile_hw), jnp.float32),
                        pltpu.VMEM((tile_c, tile_hw), jnp.float32)],
        compiler_params=pltpu.CompilerParams(
            dimension_semantics=("parallel", "arbitrary", "arbitrary"),
            vmem_limit_bytes=vmem_limit),
    )(x3, g2, b2, m2, s2)

    # ---------------- Pass 2: streamed normalize y = x*scale + bias ----------
    y3 = pl.pallas_call(
        _normalize_kernel,
        out_shape=jax.ShapeDtypeStruct((N, C, hw), x.dtype),
        grid=(num_c, N, num_hw),
        in_specs=[
            pl.BlockSpec((1, tile_c, tile_hw), lambda c, n, h: (n, c, h)),
            pl.BlockSpec((tile_c, 1), lambda c, n, h: (c, 0)),
            pl.BlockSpec((tile_c, 1), lambda c, n, h: (c, 0)),
        ],
        out_specs=pl.BlockSpec((1, tile_c, tile_hw), lambda c, n, h: (n, c, h)),
        compiler_params=pltpu.CompilerParams(
            dimension_semantics=("parallel", "parallel", "parallel"),
            vmem_limit_bytes=vmem_limit),
    )(x3, scale, bias)

    return y3.reshape(N, C, H, W)

    # TODO(synk): running_avg_mean / running_avg_std updates and the r_max /
    # d_max increments are module side-effects (not part of the returned
    # tensor); they would be plain JAX updates in a stateful wrapper.


def _reference(x, gamma, beta, running_avg_mean, running_avg_std,
               eps=1e-5, r_max=1.0, d_max=0.0):
    # Pure-JAX reference mirroring the PyTorch training-mode forward.
    mean = jnp.mean(x, axis=(0, 2, 3), keepdims=True)
    n = x.shape[0] * x.shape[2] * x.shape[3]
    var = jnp.sum((x - mean) ** 2, axis=(0, 2, 3), keepdims=True) / (n - 1)
    std = jnp.clip(jnp.sqrt(var), eps, 1.0e10)
    r = jnp.clip(std / running_avg_std, 1.0 / r_max, r_max)
    d = jnp.clip((mean - running_avg_mean) / running_avg_std, -d_max, d_max)
    y = (x - mean) * r / std + d
    return gamma * y + beta


if __name__ == "__main__":
    key = jax.random.PRNGKey(0)
    N, C, H, W = 2, 4, 16, 16

    x = jax.random.normal(key, (N, C, H, W), dtype=jnp.float32)

    # Deterministic parameter init matching the module's __init__.
    gamma = jnp.ones((1, C, 1, 1), dtype=jnp.float32)
    beta = jnp.zeros((1, C, 1, 1), dtype=jnp.float32)
    running_avg_mean = jnp.ones((1, C, 1, 1), dtype=jnp.float32)
    running_avg_std = jnp.zeros((1, C, 1, 1), dtype=jnp.float32)

    y = batch_renorm_2d(x, gamma, beta, running_avg_mean, running_avg_std,
                        eps=1e-5, r_max=1.0, d_max=0.0)
    y = jax.block_until_ready(y)

    y_ref = _reference(x, gamma, beta, running_avg_mean, running_avg_std)
    assert y.shape == (N, C, H, W)
    assert jnp.allclose(y, y_ref, atol=1e-4, rtol=1e-4), "mismatch vs reference"

    print("KERNEL_OK")
</pallas_src>

<mosaic_0001>
module attributes {stable_mosaic.version = 11 : i64} {
  func.func @_stats_scale_bias_kernel(%arg0: i32, %arg1: i32, %arg2: i32, %arg3: memref<1x4x256xf32, #tpu.memory_space<vmem>>, %arg4: memref<4x1xf32, #tpu.memory_space<vmem>>, %arg5: memref<4x1xf32, #tpu.memory_space<vmem>>, %arg6: memref<4x1xf32, #tpu.memory_space<vmem>>, %arg7: memref<4x1xf32, #tpu.memory_space<vmem>>, %arg8: memref<4x1xf32, #tpu.memory_space<vmem>>, %arg9: memref<4x1xf32, #tpu.memory_space<vmem>>, %arg10: memref<4x256xf32, #tpu.memory_space<vmem>>, %arg11: memref<4x256xf32, #tpu.memory_space<vmem>>) attributes {dimension_semantics = [#tpu.dimension_semantics<parallel>, #tpu.dimension_semantics<arbitrary>, #tpu.dimension_semantics<arbitrary>], iteration_bounds = array<i64: 1, 2, 1>, scalar_prefetch = 0 : i64, scratch_operands = 2 : i64, tpu.core_type = #tpu.core_type<tc>, window_params = [{transform_indices = @transform_0, window_bounds = array<i64: 1, 4, 256>}, {transform_indices = @transform_1, window_bounds = array<i64: 4, 1>}, {transform_indices = @transform_2, window_bounds = array<i64: 4, 1>}, {transform_indices = @transform_3, window_bounds = array<i64: 4, 1>}, {transform_indices = @transform_4, window_bounds = array<i64: 4, 1>}, {transform_indices = @transform_5, window_bounds = array<i64: 4, 1>}, {transform_indices = @transform_6, window_bounds = array<i64: 4, 1>}]} {
    %c0_i32 = arith.constant 0 : i32
    %0 = arith.cmpi eq, %arg1, %c0_i32 : i32
    %c0_i32_0 = arith.constant 0 : i32
    %1 = arith.cmpi eq, %arg2, %c0_i32_0 : i32
    %2 = arith.andi %0, %1 : i1
    %3 = arith.extui %2 : i1 to i32
    %c0_i32_1 = arith.constant 0 : i32
    %4 = arith.cmpi ne, %3, %c0_i32_1 : i32
    scf.if %4 {
      %cst = arith.constant 0.000000e+00 : f32
      %19 = vector.broadcast %cst : f32 to vector<4x256xf32>
      %c0_14 = arith.constant 0 : index
      %c0_15 = arith.constant 0 : index
      %20 = vector.load %arg10[%c0_14, %c0_15] : memref<4x256xf32, #tpu.memory_space<vmem>>, vector<4x256xf32>
      tpu.vector_store %arg10[%c0_14, %c0_15], %19 {strides = array<i32>} : memref<4x256xf32, #tpu.memory_space<vmem>>, vector<4x256xf32>,
      %cst_16 = arith.constant 0.000000e+00 : f32
      %21 = vector.broadcast %cst_16 : f32 to vector<4x256xf32>
      %c0_17 = arith.constant 0 : index
      %c0_18 = arith.constant 0 : index
      %22 = vector.load %arg11[%c0_17, %c0_18] : memref<4x256xf32, #tpu.memory_space<vmem>>, vector<4x256xf32>
      tpu.vector_store %arg11[%c0_17, %c0_18], %21 {strides = array<i32>} : memref<4x256xf32, #tpu.memory_space<vmem>>, vector<4x256xf32>,
    } else {
    }
    %c0 = arith.constant 0 : index
    %c0_2 = arith.constant 0 : index
    %c0_3 = arith.constant 0 : index
    %5 = vector.load %arg3[%c0, %c0_2, %c0_3] : memref<1x4x256xf32, #tpu.memory_space<vmem>>, vector<1x4x256xf32>
    %6 = vector.shape_cast %5 : vector<1x4x256xf32> to vector<4x256xf32>
    %c0_4 = arith.constant 0 : index
    %c0_5 = arith.constant 0 : index
    %7 = vector.load %arg10[%c0_4, %c0_5] : memref<4x256xf32, #tpu.memory_space<vmem>>, vector<4x256xf32>
    %8 = arith.addf %7, %6 : vector<4x256xf32>
    %c0_6 = arith.constant 0 : index
    %c0_7 = arith.constant 0 : index
    %9 = vector.load %arg10[%c0_6, %c0_7] : memref<4x256xf32, #tpu.memory_space<vmem>>, vector<4x256xf32>
    tpu.vector_store %arg10[%c0_6, %c0_7], %8 {strides = array<i32>} : memref<4x256xf32, #tpu.memory_space<vmem>>, vector<4x256xf32>,
    %c0_8 = arith.constant 0 : index
    %c0_9 = arith.constant 0 : index
    %10 = vector.load %arg11[%c0_8, %c0_9] : memref<4x256xf32, #tpu.memory_space<vmem>>, vector<4x256xf32>
    %11 = arith.mulf %6, %6 : vector<4x256xf32>
    %12 = arith.addf %10, %11 : vector<4x256xf32>
    %c0_10 = arith.constant 0 : index
    %c0_11 = arith.constant 0 : index
    %13 = vector.load %arg11[%c0_10, %c0_11] : memref<4x256xf32, #tpu.memory_space<vmem>>, vector<4x256xf32>
    tpu.vector_store %arg11[%c0_10, %c0_11], %12 {strides = array<i32>} : memref<4x256xf32, #tpu.memory_space<vmem>>, vector<4x256xf32>,
    %c1_i32 = arith.constant 1 : i32
    %14 = arith.cmpi eq, %arg1, %c1_i32 : i32
    %c0_i32_12 = arith.constant 0 : i32
    %15 = arith.cmpi eq, %arg2, %c0_i32_12 : i32
    %16 = arith.andi %14, %15 : i1
    %17 = arith.extui %16 : i1 to i32
    %c0_i32_13 = arith.constant 0 : i32
    %18 = arith.cmpi ne, %17, %c0_i32_13 : i32
    scf.if %18 {
      %c0_14 = arith.constant 0 : index
      %c0_15 = arith.constant 0 : index
      %19 = vector.load %arg10[%c0_14, %c0_15] : memref<4x256xf32, #tpu.memory_space<vmem>>, vector<4x256xf32>
      %cst = arith.constant dense<0.000000e+00> : vector<4xf32>
      %20 = vector.multi_reduction <add>, %19, %cst [1] : vector<4x256xf32> to vector<4xf32>
      %21 = vector.shape_cast %20 : vector<4xf32> to vector<4x1xf32>
      %c0_16 = arith.constant 0 : index
      %c0_17 = arith.constant 0 : index
      %22 = vector.load %arg11[%c0_16, %c0_17] : memref<4x256xf32, #tpu.memory_space<vmem>>, vector<4x256xf32>
      %cst_18 = arith.constant dense<0.000000e+00> : vector<4xf32>
      %23 = vector.multi_reduction <add>, %22, %cst_18 [1] : vector<4x256xf32> to vector<4xf32>
      %24 = vector.shape_cast %23 : vector<4xf32> to vector<4x1xf32>
      %cst_19 = arith.constant 5.120000e+02 : f32
      %25 = vector.broadcast %cst_19 : f32 to vector<4x1xf32>
      %26 = arith.divf %21, %25 : vector<4x1xf32>
      %cst_20 = arith.constant 5.120000e+02 : f32
      %27 = vector.broadcast %cst_20 : f32 to vector<4x1xf32>
      %28 = arith.mulf %27, %26 : vector<4x1xf32>
      %29 = arith.mulf %28, %26 : vector<4x1xf32>
      %30 = arith.subf %24, %29 : vector<4x1xf32>
      %cst_21 = arith.constant 0.000000e+00 : f32
      %31 = vector.broadcast %cst_21 : f32 to vector<4x1xf32>
      %32 = arith.maximumf %30, %31 : vector<4x1xf32>
      %cst_22 = arith.constant 5.110000e+02 : f32
      %33 = vector.broadcast %cst_22 : f32 to vector<4x1xf32>
      %34 = arith.divf %32, %33 : vector<4x1xf32>
      %35 = math.sqrt %34 : vector<4x1xf32>
      %cst_23 = arith.constant 9.99999974E-6 : f32
      %cst_24 = arith.constant 1.000000e+10 : f32
      %36 = vector.broadcast %cst_23 : f32 to vector<4x1xf32>
      %37 = arith.maximumf %36, %35 : vector<4x1xf32>
      %38 = vector.broadcast %cst_24 : f32 to vector<4x1xf32>
      %39 = arith.minimumf %38, %37 : vector<4x1xf32>
      %c0_25 = arith.constant 0 : index
      %c0_26 = arith.constant 0 : index
      %40 = vector.load %arg4[%c0_25, %c0_26] : memref<4x1xf32, #tpu.memory_space<vmem>>, vector<4x1xf32>
      %c0_27 = arith.constant 0 : index
      %c0_28 = arith.constant 0 : index
      %41 = vector.load %arg5[%c0_27, %c0_28] : memref<4x1xf32, #tpu.memory_space<vmem>>, vector<4x1xf32>
      %c0_29 = arith.constant 0 : index
      %c0_30 = arith.constant 0 : index
      %42 = vector.load %arg6[%c0_29, %c0_30] : memref<4x1xf32, #tpu.memory_space<vmem>>, vector<4x1xf32>
      %c0_31 = arith.constant 0 : index
      %c0_32 = arith.constant 0 : index
      %43 = vector.load %arg7[%c0_31, %c0_32] : memref<4x1xf32, #tpu.memory_space<vmem>>, vector<4x1xf32>
      %44 = arith.divf %39, %43 : vector<4x1xf32>
      %cst_33 = arith.constant 1.000000e+00 : f32
      %cst_34 = arith.constant 1.000000e+00 : f32
      %45 = vector.broadcast %cst_33 : f32 to vector<4x1xf32>
      %46 = arith.maximumf %45, %44 : vector<4x1xf32>
      %47 = vector.broadcast %cst_34 : f32 to vector<4x1xf32>
      %48 = arith.minimumf %47, %46 : vector<4x1xf32>
      %49 = arith.subf %26, %42 : vector<4x1xf32>
      %50 = arith.divf %49, %43 : vector<4x1xf32>
      %cst_35 = arith.constant -0.000000e+00 : f32
      %cst_36 = arith.constant 0.000000e+00 : f32
      %51 = vector.broadcast %cst_35 : f32 to vector<4x1xf32>
      %52 = arith.maximumf %51, %50 : vector<4x1xf32>
      %53 = vector.broadcast %cst_36 : f32 to vector<4x1xf32>
      %54 = arith.minimumf %53, %52 : vector<4x1xf32>
      %55 = arith.mulf %40, %48 : vector<4x1xf32>
      %56 = arith.divf %55, %39 : vector<4x1xf32>
      %57 = arith.mulf %40, %54 : vector<4x1xf32>
      %58 = arith.addf %57, %41 : vector<4x1xf32>
      %59 = arith.mulf %26, %56 : vector<4x1xf32>
      %60 = arith.subf %58, %59 : vector<4x1xf32>
      %c0_37 = arith.constant 0 : index
      %c0_38 = arith.constant 0 : index
      %61 = vector.load %arg8[%c0_37, %c0_38] : memref<4x1xf32, #tpu.memory_space<vmem>>, vector<4x1xf32>
      tpu.vector_store %arg8[%c0_37, %c0_38], %56 {strides = array<i32>} : memref<4x1xf32, #tpu.memory_space<vmem>>, vector<4x1xf32>,
      %c0_39 = arith.constant 0 : index
      %c0_40 = arith.constant 0 : index
      %62 = vector.load %arg9[%c0_39, %c0_40] : memref<4x1xf32, #tpu.memory_space<vmem>>, vector<4x1xf32>
      tpu.vector_store %arg9[%c0_39, %c0_40], %60 {strides = array<i32>} : memref<4x1xf32, #tpu.memory_space<vmem>>, vector<4x1xf32>,
    } else {
    }
    return
  }
  func.func @transform_0(%arg0: i32, %arg1: i32, %arg2: i32) -> (i32, i32, i32) {
    %c0_i32 = arith.constant 0 : i32
    return %arg1, %arg0, %arg2 : i32, i32, i32
  }
  func.func @transform_1(%arg0: i32, %arg1: i32, %arg2: i32) -> (i32, i32) {
    %c0_i32 = arith.constant 0 : i32
    %c0_i32_0 = arith.constant 0 : i32
    return %arg0, %c0_i32 : i32, i32
  }
  func.func @transform_2(%arg0: i32, %arg1: i32, %arg2: i32) -> (i32, i32) {
    %c0_i32 = arith.constant 0 : i32
    %c0_i32_0 = arith.constant 0 : i32
    return %arg0, %c0_i32 : i32, i32
  }
  func.func @transform_3(%arg0: i32, %arg1: i32, %arg2: i32) -> (i32, i32) {
    %c0_i32 = arith.constant 0 : i32
    %c0_i32_0 = arith.constant 0 : i32
    return %arg0, %c0_i32 : i32, i32
  }
  func.func @transform_4(%arg0: i32, %arg1: i32, %arg2: i32) -> (i32, i32) {
    %c0_i32 = arith.constant 0 : i32
    %c0_i32_0 = arith.constant 0 : i32
    return %arg0, %c0_i32 : i32, i32
  }
  func.func @transform_5(%arg0: i32, %arg1: i32, %arg2: i32) -> (i32, i32) {
    %c0_i32 = arith.constant 0 : i32
    %c0_i32_0 = arith.constant 0 : i32
    return %arg0, %c0_i32 : i32, i32
  }
  func.func @transform_6(%arg0: i32, %arg1: i32, %arg2: i32) -> (i32, i32) {
    %c0_i32 = arith.constant 0 : i32
    %c0_i32_0 = arith.constant 0 : i32
    return %arg0, %c0_i32 : i32, i32
  }
}

</mosaic_0001>

<bundles_post_ra>
// kernel: tpu_custom_call.1
= control target key start
LH: loop header
LB: loop body
LE: loop exit
PB: predicated region body
PF: predicated region fallthrough
CT: control target
= control target key end

     0   :  { %s732_s21 = smov 0   ;;  %s734_s22 = smov 0   ;;  %s780_s0 = inlined_call_operand.vmem [shape: f32[2,4,256], index: 0, kind: input, shape index: {}]   ;;  %s781_s1 = inlined_call_operand.vmem [shape: f32[4,1], index: 1, kind: input, shape index: {}]   ;;  %s782_s2 = inlined_call_operand.vmem [shape: f32[4,1], index: 2, kind: input, shape index: {}]   ;;  %s783_s3 = inlined_call_operand.vmem [shape: f32[4,1], index: 3, kind: input, shape index: {}]   ;;  %s784_s4 = inlined_call_operand.vmem [shape: f32[4,1], index: 4, kind: input, shape index: {}]   ;;  %s785_s5 = inlined_call_operand.vmem [shape: f32[4,1], index: 5, kind: output, shape index: {0}]   ;;  %s786_s6 = inlined_call_operand.vmem [shape: f32[4,1], index: 6, kind: output, shape index: {1}]  }
   0x1   :  { %s736_s23 = smov 0  }
   0x2 LB: > { %s32_s24 = sadd.s32 1, %s690_s22  ;;  %p626_p0 = scmp.ge.s32.totalorder %s694_s23, 1  ;;  %s694_s23 = sphi %s736_s23, %s17_s23   ;;  %s690_s22 = sphi %s734_s22, %s788_s22   ;;  %s686_s21 = sphi %s732_s21, %s787_s21  }
   0x3   : > { %p34_p1 = scmp.ge.s32.totalorder %s32_s24, 2  ;;  %p283_p2 = scmp.lt.s32.totalorder %s694_s23, 3 }
   0x5   : > { %s790_s24 = smov (%p34_p1, %s32_s24), 0  ;;  %p284_p3 = pnand %p626_p0, %p283_p2 }
   0x6   : > { %p341_p4 = scmp.lt.s32.totalorder (!%p284_p3), %s686_s21, 1  ;;  %p378_p5 = scmp.eq.s32.totalorder (!%p284_p3), %s686_s21, 0 }
   0x7   : > { %287 = sbr.rel (%p284_p3) target bundleno = 229 (0xe5), region = 40 }
   0xc   : > { %s342_s25 = scalar_select %p341_p4, %s686_s21, 1  ;;  %v696_v0 = vmov (%p378_p5), 0.0  }
   0xd   : > { %383 = sbr.rel (!%p378_p5) target bundleno = 18 (0x12), region = 44  ;;  %384 = vst [vmem:[#allocation2] sm:$0xff] (%p378_p5), %v696_v0  ;;  %385 = vst [vmem:[#allocation3] sm:$0xff] (%p378_p5), %v696_v0 }
   0xe   : > { %s636_s26 = sshll.u32 %s342_s25, 3 }
   0xf   : > { %s352_s29 = scalar_lea.vmem %s780_s0, %s636_s26 }
  0x12 PF: > { %v386_v1 = vld [vmem:[%s352_s29] sm:$0xff]  ;;  %p394_p6 = scmp.eq.s32.totalorder %s686_s21, 1 }
  0x13   : > { %v391_v5 = vmul.f32 %v386_v1, %v386_v1  ;;  %vm403_vm0 = vcmask (%p394_p6), 1043456   ;;  %v438_v25 = vld [vmem:[%s784_s4] sm:$0xf] (%p394_p6)  ;;  %vm454_vm3 = vcmask (%p394_p6), 3072  }
  0x14   : > { %v387_v2 = vld [vmem:[#allocation2] sm:$0xff]  ;;  %v390_v3 = vld [vmem:[#allocation3] sm:$0xff]  ;;  %398 = sbr.rel (!%p394_p6) target bundleno = 229 (0xe5), region = 48 }
  0x15   : > { %v388_v4 = vadd.f32 %v387_v2, %v386_v1  ;;  %v392_v6 = vadd.f32 %v391_v5, %v390_v3  ;;  %v437_v32 = vld [vmem:[%s783_s3] sm:$0xf] (%p394_p6) }
  0x16   : > { %v435_v41 = vld [vmem:[%s781_s1] sm:$0xf] (%p394_p6) }
  0x17   : > { %389 = vst [vmem:[#allocation2] sm:$0xff] %v388_v4  ;;  %393 = vst [vmem:[#allocation3] sm:$0xff] %v392_v6  ;;  %v436_v45 = vld [vmem:[%s782_s2] sm:$0xf] (%p394_p6) }
  0x1e   : > { %v399_v7 = vld [vmem:[#allocation2] sm:$0xff]  ;;  %v409_v8 = vld [vmem:[#allocation3] sm:$0xff] }
  0x1f   : > { %v401_v9 = vcombine.high %v399_v7, %v399_v7  ;;  %v404_v10 = vsel %vm403_vm0, %v399_v7, 0.0  ;;  %v411_v11 = vcombine.high %v409_v8, %v409_v8  ;;  %v413_v13 = vsel %vm403_vm0, %v409_v8, 0.0 }
  0x21   : > { %v405_v12 = vsel %vm403_vm0, %v401_v9, 0.0  ;;  %v414_v14 = vsel %vm403_vm0, %v411_v11, 0.0 }
  0x22   : > { %v406_v15 = vadd.f32 %v405_v12, %v404_v10  ;;  %v415_v16 = vadd.f32 %v414_v14, %v413_v13 }
  0x24   : > { %407 = vadd.xlane.f32.xlu0 %v406_v15 }
  0x28   : > { %416 = vadd.xlane.f32.xlu0 %v415_v16 }
  0xad   : > { %v408_v17 = vpop.xlane.xlu0 %407 }
  0xae   : > { %v419_v18 = vmul.f32 0.001953125, %v408_v17 }
  0xb0   : > { %v420_v19 = vmul.f32 512.0, %v419_v18  ;;  %v443_v35 = vsub.f32 %v419_v18, %v437_v32 }
  0xb1   : > { %v417_v20 = vpop.xlane.xlu0 %416 }
  0xb2   : > { %v421_v21 = vmul.f32 %v420_v19, %v419_v18 }
  0xb4   : > { %v422_v22 = vsub.f32 %v417_v20, %v421_v21 }
  0xb6   : > { %v423_v23 = vmax.f32 %v422_v22, 0.0 }
  0xb8   : > { %v425_v24 = vmul.f32 0.0019569471, %v423_v23 }
  0xba   : > { %666 = vrsqrt.f32 %v425_v24  ;;  %vm428_vm1 = vcmp.eq.f32.partialorder %v425_v24, inf  ;;  %v431_v28 = vand.u32 2147483648, %v425_v24  ;;  %vm430_vm2 = vcmp.eq.f32.partialorder %v425_v24, 0.0 }
  0xbb   : > { %668 = vrcp.f32 %v438_v25 }
  0xc7   : > { %v667_v26 = vpop.eup %666 }
  0xc8   : > { %v427_v27 = vmul.f32 %v667_v26, %v425_v24  ;;  %v669_v34 = vpop.eup %668 }
  0xc9   : > { %v444_v37 = vmul.f32 %v669_v34, %v443_v35 }
  0xca   : > { %v429_v29 = vsel %vm428_vm1, %v425_v24, %v427_v27 }
  0xcb   : > { %v432_v30 = vsel %vm430_vm2, %v431_v28, %v429_v29  ;;  %v631_v39 = vclamps-f32 %v444_v37, 0.0 }
  0xcc   : > { %v433_v31 = vmax.f32 %v432_v30, 1e-05 }
  0xcd   : > { %v450_v42 = vmul.f32 %v631_v39, %v435_v41 }
  0xce   : > { %v434_v33 = vmin.f32 %v433_v31, 1e+10 }
  0xcf   : > { %v451_v47 = vadd.f32 %v450_v42, %v436_v45 }
  0xd0   : > { %v440_v36 = vmul.f32 %v669_v34, %v434_v33  ;;  %670 = vrcp.f32 %v434_v33 }
  0xd2   : > { %v441_v38 = vmax.f32 %v440_v36, 1.0 }
  0xd4   : > { %v442_v40 = vmin.f32 %v441_v38, 1.0 }
  0xd6   : > { %v447_v43 = vmul.f32 %v442_v40, %v435_v41 }
  0xdd   : > { %v671_v44 = vpop.eup %670 }
  0xde   : > { %v449_v46 = vmul.f32 %v671_v44, %v447_v43 }
  0xe0   : > { %v452_v48 = vmul.f32 %v449_v46, %v419_v18  ;;  %455 = vst.msk [vmem:[%s785_s5] sm:$0xf] %vm454_vm3, %v449_v46 }
  0xe2   : > { %v453_v49 = vsub.f32 %v451_v47, %v452_v48 }
  0xe4   : > { %456 = vst.msk [vmem:[%s786_s6] sm:$0xf] %vm454_vm3, %v453_v49 }
  0xe5 PF: > { %s17_s23 = sadd.s32 1, %s694_s23   ;;  %s787_s21 = smov %s690_s22 }
  0xe6   : > { %p14_p7 = scmp.ge.s32.totalorder %s17_s23, 4   ;;  %s788_s22 = smov %s790_s24 }
  0xe8   :  { %16 = sbr.rel (!%p14_p7) target bundleno = 2 (0x2), region = 102 }

</bundles_post_ra>
